<compile_context>
chip_gen: v7x
topology: tpu7x:2x2x1
jax: 0.10.0
libtpu: 0.0.40
codegen_flags: <defaults>
</compile_context>

<pallas_src>
import functools

import jax
import jax.numpy as jnp
from jax.experimental import pallas as pl
from jax.experimental.pallas import tpu as pltpu

LANE = 128      # vreg lane width
SUBLANE = 8     # vreg sublane count (f32)


def _round_up(x, m):
    return ((x + m - 1) // m) * m


def _actor_kernel(x_ref, w1_ref, b1_ref, w2_ref, b2_ref, out_ref, *, action_bound):
    # First Linear (MXU) + bias + ReLU (VPU epilogue).
    h = jnp.dot(x_ref[...], w1_ref[...], preferred_element_type=jnp.float32)
    h = jnp.maximum(h + b1_ref[...], 0.0)
    # Second Linear (MXU) + bias, Tanh (EUP) and action-bound scale.
    a = jnp.dot(h, w2_ref[...], preferred_element_type=jnp.float32) + b2_ref[...]
    out_ref[...] = jnp.tanh(a) * action_bound


def prepare_actor_params(w1, b1, w2, b2):
    """One-time setup: pad PyTorch-layout params to lane-dense shapes.

    w1: (H, S) first nn.Linear weight     b1: (H,)
    w2: (A, H) second nn.Linear weight    b2: (A,)

    Returns pre-transposed (in, out) padded tensors so the kernel does x @ W:
      w1_p: (S_pad, H_pad), b1_p: (1, H_pad), w2_p: (H_pad, A_pad), b2_p: (1, A_pad)
    Zero padding cannot leak into results (padded lanes give tanh(0)*bound = 0
    and are sliced off by the wrapper).
    """
    H, S = w1.shape
    A = w2.shape[0]
    S_pad = _round_up(S, LANE)   # 16  -> 128
    H_pad = _round_up(H, LANE)   # 300 -> 384
    A_pad = _round_up(A, LANE)   # 4   -> 128

    w1_p = jnp.zeros((S_pad, H_pad), jnp.float32).at[:S, :H].set(w1.T)
    b1_p = jnp.zeros((1, H_pad), jnp.float32).at[0, :H].set(b1)
    w2_p = jnp.zeros((H_pad, A_pad), jnp.float32).at[:H, :A].set(w2.T)
    b2_p = jnp.zeros((1, A_pad), jnp.float32).at[0, :A].set(b2)
    return w1_p, b1_p, w2_p, b2_p


def actor_net_forward(states, w1_p, b1_p, w2_p, b2_p, *, action_bound, action_dim,
                      block_b=256):
    """states: (B, state_dim) float32 -> (B, action_dim) float32."""
    B, S = states.shape
    S_pad, H_pad = w1_p.shape
    A_pad = w2_p.shape[1]

    # Batch tile: multiple of 8 sublanes, up to block_b rows per grid step.
    # (block_b=256 fills the v6e/v7x MXU; still fine (2x128) on v5e.)
    tile_b = min(block_b, _round_up(B, SUBLANE))
    B_pad = _round_up(B, tile_b)

    # Single pad op covers both the batch tail and the K (state) dim padding.
    x = jnp.pad(states.astype(jnp.float32), ((0, B_pad - B), (0, S_pad - S)))

    kernel = functools.partial(_actor_kernel, action_bound=float(action_bound))

    # VMEM footprint (tile_b=256): x 128KB + W1 192KB + W2 192KB + out 128KB
    # plus the 384KB hidden intermediate -> ~1 MB; comfortably under the
    # default scoped VMEM limit on v5e/v6e/v7x, so no vmem_limit_bytes needed.
    out = pl.pallas_call(
        kernel,
        out_shape=jax.ShapeDtypeStruct((B_pad, A_pad), jnp.float32),
        grid=(B_pad // tile_b,),
        in_specs=[
            pl.BlockSpec((tile_b, S_pad), lambda i: (i, 0)),   # states tile
            pl.BlockSpec((S_pad, H_pad), lambda i: (0, 0)),    # W1^T (VMEM-resident)
            pl.BlockSpec((1, H_pad),     lambda i: (0, 0)),    # b1   (VMEM-resident)
            pl.BlockSpec((H_pad, A_pad), lambda i: (0, 0)),    # W2^T (VMEM-resident)
            pl.BlockSpec((1, A_pad),     lambda i: (0, 0)),    # b2   (VMEM-resident)
        ],
        out_specs=pl.BlockSpec((tile_b, A_pad), lambda i: (i, 0)),
        compiler_params=pltpu.CompilerParams(
            dimension_semantics=("parallel",)),                # 2 TCs on v7x
    )(x, w1_p, b1_p, w2_p, b2_p)

    # Slice away batch-tail and lane padding.
    return out[:B, :action_dim]


if __name__ == "__main__":
    # Small shapes consistent with the module's forward.
    batch = 8
    state_dim = 16
    action_dim = 4
    num_hiddens = 300
    action_bound = (-2.0, 2.0)   # forward uses action_bound[1]

    key = jax.random.PRNGKey(0)
    k_x, k_w1, k_w2 = jax.random.split(key, 3)

    # Deterministic init matching the module: weights ~ N(0, 0.001), biases = 0.
    states = jax.random.normal(k_x, (batch, state_dim), dtype=jnp.float32)
    # PyTorch stores nn.Linear weight as (out, in).
    w1 = 0.001 * jax.random.normal(k_w1, (num_hiddens, state_dim), dtype=jnp.float32)
    w2 = 0.001 * jax.random.normal(k_w2, (action_dim, num_hiddens), dtype=jnp.float32)
    b1 = jnp.zeros((num_hiddens,), dtype=jnp.float32)
    b2 = jnp.zeros((action_dim,), dtype=jnp.float32)

    # One-time parameter preparation (padding + transpose), reused across calls.
    w1_p, b1_p, w2_p, b2_p = prepare_actor_params(w1, b1, w2, b2)

    out = actor_net_forward(states, w1_p, b1_p, w2_p, b2_p,
                            action_bound=action_bound[1], action_dim=action_dim)
    out = jax.block_until_ready(out)

    # Pure-JAX reference of the unpadded math.
    ref = jnp.tanh(jnp.maximum(states @ w1.T + b1, 0.0) @ w2.T + b2) * action_bound[1]
    assert out.shape == (batch, action_dim)
    assert jnp.allclose(out, ref, atol=1e-5, rtol=1e-5)

    print("KERNEL_OK")
</pallas_src>

<mosaic_0001>
module attributes {stable_mosaic.version = 11 : i64} {
  func.func @_actor_kernel(%arg0: i32, %arg1: memref<8x128xf32, #tpu.memory_space<vmem>>, %arg2: memref<128x384xf32, #tpu.memory_space<vmem>>, %arg3: memref<1x384xf32, #tpu.memory_space<vmem>>, %arg4: memref<384x128xf32, #tpu.memory_space<vmem>>, %arg5: memref<1x128xf32, #tpu.memory_space<vmem>>, %arg6: memref<8x128xf32, #tpu.memory_space<vmem>>) attributes {dimension_semantics = [#tpu.dimension_semantics<parallel>], iteration_bounds = array<i64: 1>, scalar_prefetch = 0 : i64, scratch_operands = 0 : i64, tpu.core_type = #tpu.core_type<tc>, window_params = [{transform_indices = @transform_0, window_bounds = array<i64: 8, 128>}, {pipeline_mode = #tpu.pipeline_mode<synchronous>, transform_indices = @transform_1, window_bounds = array<i64: 128, 384>}, {pipeline_mode = #tpu.pipeline_mode<synchronous>, transform_indices = @transform_2, window_bounds = array<i64: 1, 384>}, {pipeline_mode = #tpu.pipeline_mode<synchronous>, transform_indices = @transform_3, window_bounds = array<i64: 384, 128>}, {pipeline_mode = #tpu.pipeline_mode<synchronous>, transform_indices = @transform_4, window_bounds = array<i64: 1, 128>}, {transform_indices = @transform_5, window_bounds = array<i64: 8, 128>}]} {
    %c0 = arith.constant 0 : index
    %c0_0 = arith.constant 0 : index
    %0 = vector.load %arg1[%c0, %c0_0] : memref<8x128xf32, #tpu.memory_space<vmem>>, vector<8x128xf32>
    %c0_1 = arith.constant 0 : index
    %c0_2 = arith.constant 0 : index
    %1 = vector.load %arg2[%c0_1, %c0_2] : memref<128x384xf32, #tpu.memory_space<vmem>>, vector<128x384xf32>
    %cst = arith.constant dense<0.000000e+00> : vector<8x384xf32>
    %2 = tpu.matmul %0, %1, %cst {dimension_numbers = #tpu.dot_dimension_numbers<[1], [0], [0], [1], [0, 0, 1, 1], [], []>} : vector<8x128xf32>, vector<128x384xf32>, vector<8x384xf32> -> vector<8x384xf32>
    %c0_3 = arith.constant 0 : index
    %c0_4 = arith.constant 0 : index
    %3 = vector.load %arg3[%c0_3, %c0_4] : memref<1x384xf32, #tpu.memory_space<vmem>>, vector<1x384xf32>
    %4 = vector.broadcast %3 : vector<1x384xf32> to vector<8x384xf32>
    %5 = arith.addf %2, %4 : vector<8x384xf32>
    %cst_5 = arith.constant 0.000000e+00 : f32
    %6 = vector.broadcast %cst_5 : f32 to vector<8x384xf32>
    %7 = arith.maximumf %5, %6 : vector<8x384xf32>
    %c0_6 = arith.constant 0 : index
    %c0_7 = arith.constant 0 : index
    %8 = vector.load %arg4[%c0_6, %c0_7] : memref<384x128xf32, #tpu.memory_space<vmem>>, vector<384x128xf32>
    %cst_8 = arith.constant dense<0.000000e+00> : vector<8x128xf32>
    %9 = tpu.matmul %7, %8, %cst_8 {dimension_numbers = #tpu.dot_dimension_numbers<[1], [0], [0], [1], [0, 0, 1, 1], [], []>} : vector<8x384xf32>, vector<384x128xf32>, vector<8x128xf32> -> vector<8x128xf32>
    %c0_9 = arith.constant 0 : index
    %c0_10 = arith.constant 0 : index
    %10 = vector.load %arg5[%c0_9, %c0_10] : memref<1x128xf32, #tpu.memory_space<vmem>>, vector<1x128xf32>
    %11 = vector.broadcast %10 : vector<1x128xf32> to vector<8x128xf32>
    %12 = arith.addf %9, %11 : vector<8x128xf32>
    %13 = math.tanh %12 : vector<8x128xf32>
    %cst_11 = arith.constant 2.000000e+00 : f32
    %14 = vector.broadcast %cst_11 : f32 to vector<8x128xf32>
    %15 = arith.mulf %13, %14 : vector<8x128xf32>
    %c0_12 = arith.constant 0 : index
    %c0_13 = arith.constant 0 : index
    %16 = vector.load %arg6[%c0_12, %c0_13] : memref<8x128xf32, #tpu.memory_space<vmem>>, vector<8x128xf32>
    tpu.vector_store %arg6[%c0_12, %c0_13], %15 {strides = array<i32>} : memref<8x128xf32, #tpu.memory_space<vmem>>, vector<8x128xf32>,
    return
  }
  func.func @transform_0(%arg0: i32) -> (i32, i32) {
    %c0_i32 = arith.constant 0 : i32
    %c0_i32_0 = arith.constant 0 : i32
    return %arg0, %c0_i32 : i32, i32
  }
  func.func @transform_1(%arg0: i32) -> (i32, i32) {
    %c0_i32 = arith.constant 0 : i32
    %c0_i32_0 = arith.constant 0 : i32
    %c0_i32_1 = arith.constant 0 : i32
    return %c0_i32, %c0_i32_0 : i32, i32
  }
  func.func @transform_2(%arg0: i32) -> (i32, i32) {
    %c0_i32 = arith.constant 0 : i32
    %c0_i32_0 = arith.constant 0 : i32
    %c0_i32_1 = arith.constant 0 : i32
    return %c0_i32, %c0_i32_0 : i32, i32
  }
  func.func @transform_3(%arg0: i32) -> (i32, i32) {
    %c0_i32 = arith.constant 0 : i32
    %c0_i32_0 = arith.constant 0 : i32
    %c0_i32_1 = arith.constant 0 : i32
    return %c0_i32, %c0_i32_0 : i32, i32
  }
  func.func @transform_4(%arg0: i32) -> (i32, i32) {
    %c0_i32 = arith.constant 0 : i32
    %c0_i32_0 = arith.constant 0 : i32
    %c0_i32_1 = arith.constant 0 : i32
    return %c0_i32, %c0_i32_0 : i32, i32
  }
  func.func @transform_5(%arg0: i32) -> (i32, i32) {
    %c0_i32 = arith.constant 0 : i32
    %c0_i32_0 = arith.constant 0 : i32
    return %arg0, %c0_i32 : i32, i32
  }
}

</mosaic_0001>

<bundles_post_ra>
// kernel: tpu_custom_call.1
= control target key start
LH: loop header
LB: loop body
LE: loop exit
PB: predicated region body
PF: predicated region fallthrough
CT: control target
= control target key end

     0   :  { %10 = vsyncpa [#allocation3], 0  ;;  %s959_s0 = inlined_call_operand.hbm [shape: f32[8,128], index: 0, kind: input, shape index: {}]   ;;  %s960_s1 = inlined_call_operand.hbm [shape: f32[128,384], index: 1, kind: input, shape index: {}]   ;;  %s961_s2 = inlined_call_operand.vmem [shape: f32[1,384], index: 2, kind: input, shape index: {}]   ;;  %s962_s3 = inlined_call_operand.hbm [shape: f32[384,128], index: 3, kind: input, shape index: {}]   ;;  %s963_s4 = inlined_call_operand.vmem [shape: f32[1,128], index: 4, kind: input, shape index: {}]   ;;  %s964_s5 = inlined_call_operand.hbm [shape: f32[8,128], index: 5, kind: output, shape index: {}]  }
   0x1   :  { %11 = vsyncpa [#allocation6], 0 }
   0x2   :  { %12 = vsyncpa [#allocation4], 0  ;;  %s843_s18 = smov [#allocation5]   ;;  %s749_s22 = scalar_lea.hbm %s960_s1, 6144 }
   0x3   :  { %s28_s19 = sshll.u32 %s843_s18, 4  ;;  %p750_p0 = scmp.ne.s32.totalorder %s960_s1, %s749_s22  ;;  %s29_s19 = int_to_ptr.vmem [resolvable:$true] %s28_s19 }
   0x4   :  { %p753_p1 = scmp.lt.u32.totalorder %s749_s22, %s960_s1 }
   0x6   :  { %p755_p2 = pnand %p753_p1, %p750_p0 }
   0x8   :  { %758 = shalt.err (!%p755_p2)
}
   0x9   :  { %s759_s27 = scalar_lea.vmem %s29_s19, 6144  ;;  %p764_p4 = scmp.lt.s32.totalorder %s29_s19, %s29_s19 }
   0xa   :  { %p760_p3 = scmp.ne.s32.totalorder %s29_s19, %s759_s27  ;;  %p765_p5 = scmp.lt.s32.totalorder %s759_s27, %s759_s27 }
   0xc   :  { %p766_p6 = por %p765_p5, %p764_p4 }
   0xe   :  { %p767_p7 = pnand %p766_p6, %p760_p3 }
  0x10   :  { %770 = shalt.err (!%p767_p7)
}
  0x11   :  { %s844_s28 = smov 384   ;;  %s845_s29 = smov 24  }
  0x12   :  { %34 = dma.hbm_to_vmem [thread:$0]  %s960_s1, 6144, %s29_s19, [#allocation6], %s844_s28, %s844_s28, %s845_s29  }
  0x13   :  { %s846_s7 = smov [#allocation2]   ;;  %s847_s9 = smov [#allocation7]  }
  0x14   :  { %s19_s8 = sshll.u32 %s846_s7, 4  ;;  %s42_s10 = sshll.u32 %s847_s9, 4  ;;  %s20_s8 = int_to_ptr.vmem [resolvable:$true] %s19_s8  ;;  %s43_s10 = int_to_ptr.vmem [resolvable:$true] %s42_s10 }
  0x15   :  { %s771_s13 = scalar_lea.hbm %s959_s0, 128 }
  0x16   :  { %p772_p8 = scmp.ne.s32.totalorder %s959_s0, %s771_s13  ;;  %p775_p9 = scmp.lt.u32.totalorder %s771_s13, %s959_s0 }
  0x18   :  { %p777_p10 = pnand %p775_p9, %p772_p8 }
  0x1a   :  { %780 = shalt.err (!%p777_p10)
}
  0x1b   :  { %s781_s1 = scalar_lea.vmem %s20_s8, 128  ;;  %p786_p12 = scmp.lt.s32.totalorder %s20_s8, %s20_s8 }
  0x1c   :  { %p782_p11 = scmp.ne.s32.totalorder %s20_s8, %s781_s1  ;;  %p787_p13 = scmp.lt.s32.totalorder %s781_s1, %s781_s1 }
  0x1e   :  { %p788_p0 = por %p787_p13, %p786_p12 }
  0x20   :  { %p789_p1 = pnand %p788_p0, %p782_p11 }
  0x22   :  { %792 = shalt.err (!%p789_p1)
}
  0x23   :  { %22 = dma.hbm_to_vmem [thread:$0]  %s959_s0, 128, %s20_s8, [#allocation3]  }
  0x24   :  { %s793_s22 = scalar_lea.hbm %s962_s3, 6144 }
  0x25   :  { %p794_p2 = scmp.ne.s32.totalorder %s962_s3, %s793_s22  ;;  %p797_p3 = scmp.lt.u32.totalorder %s793_s22, %s962_s3 }
  0x27   :  { %p799_p4 = pnand %p797_p3, %p794_p2 }
  0x29   :  { %802 = shalt.err (!%p799_p4)
}
  0x2a   :  { %s803_s27 = scalar_lea.vmem %s43_s10, 6144  ;;  %p808_p6 = scmp.lt.s32.totalorder %s43_s10, %s43_s10 }
  0x2b   :  { %p804_p5 = scmp.ne.s32.totalorder %s43_s10, %s803_s27  ;;  %p809_p7 = scmp.lt.s32.totalorder %s803_s27, %s803_s27 }
  0x2d   :  { %p810_p8 = por %p809_p7, %p808_p6 }
  0x2f   :  { %p811_p9 = pnand %p810_p8, %p804_p5 }
  0x31   :  { %814 = shalt.err (!%p811_p9)
}
  0x32   :  { %s848_s0 = smov 128   ;;  %s849_s28 = smov 8  }
  0x33   :  { %48 = dma.hbm_to_vmem [thread:$0]  %s962_s3, 6144, %s43_s10, [#allocation6], %s848_s0, %s848_s0, %s849_s28  }
  0x34   :  { %837 = dma.done.wait [#allocation3], 128  }
  0x35   :  { %838 = vsyncadd [#allocation3], 4294967168 }
  0x36   :  { %839 = dma.done.wait [#allocation6], 12288  }
  0x37   :  { %840 = vsyncadd [#allocation6], 4294955008  ;;  %v850_v0 = vmov 0.0|0.0   ;;  %v851_v1 = vmov 0.0   ;;  %vm852_vm0 = vmmov 0   ;;  %v62_v2 = vld [vmem:[#allocation5 + $0x8] sm:$0xff] }
  0x38   :  { %656 = vmatprep.subr.bf16.mxu1 %v850_v0  ;;  %190 = vmatprep.mubr.f32.mxu0 %v851_v1  ;;  %v65_v3 = vld [vmem:[#allocation5 + $0x20] sm:$0xff]  ;;  %v64_v6 = vld [vmem:[#allocation5 + $0x18] sm:$0xff]  ;;  %v71_v8 = vld [vmem:[#allocation5 + $0x50] sm:$0xff]  ;;  %s853_s8 = smov [#allocation8]  }
  0x39   :  { %586 = vmatprep.mubr.msk.f32.mxu1 %vm852_vm0, %v851_v1  ;;  %v61_v4 = vld [vmem:[#allocation5] sm:$0xff]  ;;  %v624_v5 = vpack.c.bf16 %v65_v3, %v62_v2  ;;  %v68_v7 = vld [vmem:[#allocation5 + $0x38] sm:$0xff]  ;;  %v67_v11 = vld [vmem:[#allocation5 + $0x30] sm:$0xff]  ;;  %s474_s9 = sshll.u32 %s853_s8, 4  ;;  %s475_s9 = int_to_ptr.vmem [resolvable:$true] %s474_s9 }
  0x3a   :  { %v626_v9 = vpack.c.bf16 %v64_v6, %v61_v4  ;;  %v628_v10 = vpack.c.bf16 %v71_v8, %v68_v7  ;;  %v70_v12 = vld [vmem:[#allocation5 + $0x48] sm:$0xff]  ;;  %v63_v13 = vld [vmem:[#allocation5 + $0x10] sm:$0xff]  ;;  %v77_v16 = vld [vmem:[#allocation5 + $0x80] sm:$0xff]  ;;  %s815_s10 = scalar_lea.vmem %s475_s9, 128  ;;  %p820_p11 = scmp.lt.s32.totalorder %s475_s9, %s475_s9 }
  0x3b   :  { %625 = vmatprep.subr.bf16.mxu0 %v624_v5  ;;  %v66_v14 = vld [vmem:[#allocation5 + $0x28] sm:$0xff]  ;;  %v630_v17 = vpack.c.bf16 %v70_v12, %v67_v11  ;;  %v69_v19 = vld [vmem:[#allocation5 + $0x40] sm:$0xff]  ;;  %v76_v22 = vld [vmem:[#allocation5 + $0x78] sm:$0xff]  ;;  %p816_p10 = scmp.ne.s32.totalorder %s475_s9, %s815_s10  ;;  %p821_p12 = scmp.lt.s32.totalorder %s815_s10, %s815_s10 }
  0x3c   :  { %v74_v15 = vld [vmem:[#allocation5 + $0x68] sm:$0xff]  ;;  %627 = vmatpush1.bf16.msra.mxu0 %v626_v9  ;;  %v657_v18 = vpack.c.bf16 %v66_v14, %v63_v13  ;;  %v73_v21 = vld [vmem:[#allocation5 + $0x60] sm:$0xff]  ;;  %v72_v23 = vld [vmem:[#allocation5 + $0x58] sm:$0xff] }
  0x3d   :  { %629 = vmatprep.subr.bf16.mxu0 %v628_v10  ;;  %v632_v20 = vpack.c.bf16 %v77_v16, %v74_v15  ;;  %v660_v24 = vpack.c.bf16 %v72_v23, %v69_v19  ;;  %v80_v25 = vld [vmem:[#allocation5 + $0x98] sm:$0xff]  ;;  %v83_v26 = vld [vmem:[#allocation5 + $0xb0] sm:$0xff]  ;;  %v78_v28 = vld [vmem:[#allocation5 + $0x88] sm:$0xff]  ;;  %v634_v29 = vpack.c.bf16 %v76_v22, %v73_v21  ;;  %p822_p13 = por %p821_p12, %p820_p11 }
  0x3e   :  { %658 = vmatpush3.bf16.msra.mxu1 %v657_v18  ;;  %v75_v27 = vld [vmem:[#allocation5 + $0x70] sm:$0xff]  ;;  %v636_v30 = vpack.c.bf16 %v83_v26, %v80_v25  ;;  %v82_v32 = vld [vmem:[#allocation5 + $0xa8] sm:$0xff]  ;;  %v89_v35 = vld [vmem:[#allocation5 + $0xe0] sm:$0xff] }
  0x3f   :  { %659 = vmatprep.subr.bf16.mxu1 %v850_v0  ;;  %v79_v31 = vld [vmem:[#allocation5 + $0x90] sm:$0xff]  ;;  %v663_v33 = vpack.c.bf16 %v78_v28, %v75_v27  ;;  %v86_v34 = vld [vmem:[#allocation5 + $0xc8] sm:$0xff]  ;;  %v81_v36 = vld [vmem:[#allocation5 + $0xa0] sm:$0xff]  ;;  %p823_p0 = pnand %p822_p13, %p816_p10 }
  0x40   :  { %631 = vmatpush1.bf16.msra.mxu0 %v630_v17  ;;  %v84_v37 = vld [vmem:[#allocation5 + $0xb8] sm:$0xff]  ;;  %v638_v38 = vpack.c.bf16 %v82_v32, %v79_v31  ;;  %v640_v39 = vpack.c.bf16 %v89_v35, %v86_v34  ;;  %v85_v40 = vld [vmem:[#allocation5 + $0xc0] sm:$0xff]  ;;  %v95_v44 = vld [vmem:[#allocation5 + $0x110] sm:$0xff] }
  0x41   :  { %633 = vmatprep.subr.bf16.mxu0 %v632_v20  ;;  %v88_v41 = vld [vmem:[#allocation5 + $0xd8] sm:$0xff]  ;;  %v666_v42 = vpack.c.bf16 %v84_v37, %v81_v36  ;;  %v87_v45 = vld [vmem:[#allocation5 + $0xd0] sm:$0xff]  ;;  %v90_v46 = vld [vmem:[#allocation5 + $0xe8] sm:$0xff] }
  0x42   :  { %661 = vmatpush3.bf16.msra.mxu1 %v660_v24  ;;  %v92_v43 = vld [vmem:[#allocation5 + $0xf8] sm:$0xff]  ;;  %v642_v47 = vpack.c.bf16 %v88_v41, %v85_v40  ;;  %v91_v49 = vld [vmem:[#allocation5 + $0xf0] sm:$0xff]  ;;  %v94_v50 = vld [vmem:[#allocation5 + $0x108] sm:$0xff]  ;;  %v669_v51 = vpack.c.bf16 %v90_v46, %v87_v45 }
  0x43   :  { %662 = vmatprep.subr.bf16.mxu1 %v850_v0  ;;  %v644_v48 = vpack.c.bf16 %v95_v44, %v92_v43  ;;  %v98_v52 = vld [vmem:[#allocation5 + $0x128] sm:$0xff]  ;;  %v101_v53 = vld [vmem:[#allocation5 + $0x140] sm:$0xff]  ;;  %v96_v55 = vld [vmem:[#allocation5 + $0x118] sm:$0xff]  ;;  %v646_v56 = vpack.c.bf16 %v94_v50, %v91_v49 }
  0x44   :  { %635 = vmatpush1.bf16.msra.mxu0 %v634_v29  ;;  %v93_v54 = vld [vmem:[#allocation5 + $0x100] sm:$0xff]  ;;  %v648_v57 = vpack.c.bf16 %v101_v53, %v98_v52  ;;  %v100_v59 = vld [vmem:[#allocation5 + $0x138] sm:$0xff]  ;;  %v107_v62 = vld [vmem:[#allocation5 + $0x170] sm:$0xff] }
  0x45   :  { %637 = vmatprep.subr.bf16.mxu0 %v636_v30  ;;  %v97_v58 = vld [vmem:[#allocation5 + $0x120] sm:$0xff]  ;;  %v672_v60 = vpack.c.bf16 %v96_v55, %v93_v54  ;;  %v104_v61 = vld [vmem:[#allocation5 + $0x158] sm:$0xff]  ;;  %v99_v63 = vld [vmem:[#allocation5 + $0x130] sm:$0xff] }
  0x46   :  { %664 = vmatpush3.bf16.msra.mxu1 %v663_v33  ;;  %v102_v2 = vld [vmem:[#allocation5 + $0x148] sm:$0xff]  ;;  %v650_v3 = vpack.c.bf16 %v100_v59, %v97_v58  ;;  %v652_v4 = vpack.c.bf16 %v107_v62, %v104_v61  ;;  %v103_v5 = vld [vmem:[#allocation5 + $0x150] sm:$0xff]  ;;  %v286_v8 = vld [vmem:[#allocation7 + $0x80] sm:$0xff] }
  0x47   :  { %665 = vmatprep.subr.bf16.mxu1 %v850_v0  ;;  %v106_v6 = vld [vmem:[#allocation5 + $0x168] sm:$0xff]  ;;  %v675_v7 = vpack.c.bf16 %v102_v2, %v99_v63  ;;  %v105_v10 = vld [vmem:[#allocation5 + $0x160] sm:$0xff]  ;;  %v108_v11 = vld [vmem:[#allocation5 + $0x178] sm:$0xff] }
  0x48   :  { %639 = vmatpush1.bf16.msra.mxu0 %v638_v38  ;;  %v287_v9 = vld [vmem:[#allocation7 + $0x88] sm:$0xff]  ;;  %v654_v12 = vpack.c.bf16 %v106_v6, %v103_v5  ;;  %v270_v14 = vld [vmem:[#allocation7] sm:$0xff]  ;;  %v678_v16 = vpack.c.bf16 %v108_v11, %v105_v10  ;;  %v288_v17 = vld [vmem:[#allocation7 + $0x90] sm:$0xff] }
  0x49   :  { %641 = vmatprep.subr.bf16.mxu0 %v640_v39  ;;  %v680_v13 = vpack.c.bf16 %v287_v9, %v286_v8  ;;  %v271_v15 = vld [vmem:[#allocation7 + $0x8] sm:$0xff]  ;;  %v289_v18 = vld [vmem:[#allocation7 + $0x98] sm:$0xff]  ;;  %v302_v19 = vld [vmem:[#allocation7 + $0x100] sm:$0xff] }
  0x4a   :  { %667 = vmatpush3.bf16.msra.mxu1 %v666_v42  ;;  %v303_v20 = vld [vmem:[#allocation7 + $0x108] sm:$0xff]  ;;  %v60_v21 = vld [vmem:[#allocation2] sm:$0xff]  ;;  %v682_v22 = vpack.c.bf16 %v271_v15, %v270_v14  ;;  %v684_v23 = vpack.c.bf16 %v289_v18, %v288_v17  ;;  %v272_v24 = vld [vmem:[#allocation7 + $0x10] sm:$0xff] }
  0x4b   :  { %668 = vmatprep.subr.bf16.mxu1 %v850_v0  ;;  %v273_v25 = vld [vmem:[#allocation7 + $0x18] sm:$0xff]  ;;  %v713_v26 = vpack.c.bf16 %v303_v20, %v302_v19  ;;  %v290_v27 = vld [vmem:[#allocation7 + $0xa0] sm:$0xff]  ;;  %v291_v28 = vld [vmem:[#allocation7 + $0xa8] sm:$0xff] }
  0x4c   :  { %643 = vmatpush1.bf16.msra.mxu0 %v642_v47  ;;  %v304_v29 = vld [vmem:[#allocation7 + $0x110] sm:$0xff]  ;;  %v305_v30 = vld [vmem:[#allocation7 + $0x118] sm:$0xff]  ;;  %v686_v31 = vpack.c.bf16 %v273_v25, %v272_v24  ;;  %v688_v32 = vpack.c.bf16 %v291_v28, %v290_v27  ;;  %v274_v33 = vld [vmem:[#allocation7 + $0x20] sm:$0xff] }
  0x4d   :  { %645 = vmatprep.subr.bf16.mxu0 %v644_v48  ;;  %v275_v34 = vld [vmem:[#allocation7 + $0x28] sm:$0xff]  ;;  %v716_v35 = vpack.c.bf16 %v305_v30, %v304_v29  ;;  %v292_v36 = vld [vmem:[#allocation7 + $0xb0] sm:$0xff]  ;;  %v293_v37 = vld [vmem:[#allocation7 + $0xb8] sm:$0xff] }
  0x4e   :  { %670 = vmatpush3.bf16.msra.mxu1 %v669_v51  ;;  %v306_v38 = vld [vmem:[#allocation7 + $0x120] sm:$0xff]  ;;  %v307_v39 = vld [vmem:[#allocation7 + $0x128] sm:$0xff]  ;;  %v690_v40 = vpack.c.bf16 %v275_v34, %v274_v33  ;;  %v692_v41 = vpack.c.bf16 %v293_v37, %v292_v36  ;;  %v276_v42 = vld [vmem:[#allocation7 + $0x30] sm:$0xff] }
  0x4f   :  { %671 = vmatprep.subr.bf16.mxu1 %v850_v0  ;;  %v277_v43 = vld [vmem:[#allocation7 + $0x38] sm:$0xff]  ;;  %v719_v44 = vpack.c.bf16 %v307_v39, %v306_v38  ;;  %v294_v45 = vld [vmem:[#allocation7 + $0xc0] sm:$0xff]  ;;  %v295_v46 = vld [vmem:[#allocation7 + $0xc8] sm:$0xff] }
  0x50   :  { %647 = vmatpush1.bf16.msra.mxu0 %v646_v56  ;;  %v308_v47 = vld [vmem:[#allocation7 + $0x130] sm:$0xff]  ;;  %v309_v48 = vld [vmem:[#allocation7 + $0x138] sm:$0xff]  ;;  %v696_v49 = vpack.c.bf16 %v295_v46, %v294_v45  ;;  %v278_v50 = vld [vmem:[#allocation7 + $0x40] sm:$0xff] }
  0x51   :  { %649 = vmatprep.subr.bf16.mxu0 %v648_v57  ;;  %v279_v51 = vld [vmem:[#allocation7 + $0x48] sm:$0xff]  ;;  %v722_v52 = vpack.c.bf16 %v309_v48, %v308_v47  ;;  %v296_v53 = vld [vmem:[#allocation7 + $0xd0] sm:$0xff]  ;;  %v297_v54 = vld [vmem:[#allocation7 + $0xd8] sm:$0xff] }
  0x52   :  { %673 = vmatpush3.bf16.msra.mxu1 %v672_v60  ;;  %v310_v55 = vld [vmem:[#allocation7 + $0x140] sm:$0xff]  ;;  %v311_v56 = vld [vmem:[#allocation7 + $0x148] sm:$0xff]  ;;  %v698_v57 = vpack.c.bf16 %v279_v51, %v278_v50  ;;  %v700_v58 = vpack.c.bf16 %v297_v54, %v296_v53  ;;  %v280_v59 = vld [vmem:[#allocation7 + $0x50] sm:$0xff] }
  0x53   :  { %674 = vmatprep.subr.bf16.mxu1 %v850_v0  ;;  %v281_v60 = vld [vmem:[#allocation7 + $0x58] sm:$0xff]  ;;  %v725_v61 = vpack.c.bf16 %v311_v56, %v310_v55  ;;  %v298_v62 = vld [vmem:[#allocation7 + $0xe0] sm:$0xff]  ;;  %v299_v63 = vld [vmem:[#allocation7 + $0xe8] sm:$0xff] }
  0x54   :  { %651 = vmatpush1.bf16.msra.mxu0 %v650_v3  ;;  %v702_v2 = vpack.c.bf16 %v281_v60, %v280_v59  ;;  %v704_v3 = vpack.c.bf16 %v299_v63, %v298_v62  ;;  %v283_v5 = vld [vmem:[#allocation7 + $0x68] sm:$0xff]  ;;  %v312_v6 = vld [vmem:[#allocation7 + $0x150] sm:$0xff]  ;;  %v313_v8 = vld [vmem:[#allocation7 + $0x158] sm:$0xff] }
  0x55   :  { %653 = vmatprep.subr.bf16.mxu0 %v652_v4  ;;  %v282_v4 = vld [vmem:[#allocation7 + $0x60] sm:$0xff]  ;;  %v728_v9 = vpack.c.bf16 %v313_v8, %v312_v6  ;;  %v300_v10 = vld [vmem:[#allocation7 + $0xf0] sm:$0xff]  ;;  %v301_v11 = vld [vmem:[#allocation7 + $0xf8] sm:$0xff] }
  0x56   :  { %676 = vmatpush3.bf16.msra.mxu1 %v675_v7  ;;  %v706_v7 = vpack.c.bf16 %v283_v5, %v282_v4  ;;  %v285_v14 = vld [vmem:[#allocation7 + $0x78] sm:$0xff]  ;;  %v314_v15 = vld [vmem:[#allocation7 + $0x160] sm:$0xff]  ;;  %v315_v17 = vld [vmem:[#allocation7 + $0x168] sm:$0xff] }
  0x57   :  { %677 = vmatprep.subr.bf16.mxu1 %v850_v0  ;;  %v731_v18 = vpack.c.bf16 %v315_v17, %v314_v15  ;;  %v316_v19 = vld [vmem:[#allocation7 + $0x170] sm:$0xff]  ;;  %v317_v20 = vld [vmem:[#allocation7 + $0x178] sm:$0xff] }
  0x58   :  { %655 = vmatpush1.bf16.msra.mxu0 %v654_v12  ;;  %v708_v12 = vpack.c.bf16 %v301_v11, %v300_v10  ;;  %v109_v25 = vld [vmem:[%s961_s2] sm:$0x7] }
  0x59   :  { %681 = vmatprep.subr.bf16.mxu0 %v680_v13  ;;  %v284_v13 = vld [vmem:[#allocation7 + $0x70] sm:$0xff] }
  0x5a   :  { %679 = vmatpush3.bf16.msra.mxu1 %v678_v16  ;;  %v710_v16 = vpack.c.bf16 %v285_v14, %v284_v13 }
  0x5b   :  { %191 = vmatmul.mubr.f32.vlgmr.msra.gmra.mrb[0].mxu0 %v60_v21  ;;  %712 = vmatprep.subr.bf16.mxu1 %v850_v0 }
  0x5c   :  { %683 = vmatpush3.bf16.msra.mxu0 %v682_v22  ;;  %v111_v22 = vlaneseq }
  0x5d   :  { %587 = vmatmul.mubr.f32.vlgmr.msra.gmra.mrb[0].mxu1 %v60_v21  ;;  %685 = vmatprep.subr.bf16.mxu0 %v684_v23  ;;  %v734_v21 = vpack.c.bf16 %v317_v20, %v316_v19 }
  0x5e   :  { %714 = vmatpush3.bf16.msra.mxu1 %v713_v26  ;;  %621 = vmatprep.mubr.msk.f32.mxu1 %vm852_vm0, %v851_v1  ;;  %v694_v1 = vpack.c.bf16 %v277_v43, %v276_v42  ;;  %v112_v23 = vshrl.u32 %v111_v22, 7  ;;  %v484_v43 = vld [vmem:[%s963_s4] ss:$0 sm:$0xff] }
  0x5f   :  { %715 = vmatprep.subr.bf16.mxu1 %v850_v0 }
  0x60   :  { %687 = vmatpush3.bf16.msra.mxu0 %v686_v31  ;;  %v113_v24 = vsub.s32 0, %v112_v23  ;;  %v117_v26 = vsub.s32 1, %v112_v23  ;;  %v121_v27 = vsub.s32 2, %v112_v23 }
  0x61   :  { %689 = vmatprep.subr.bf16.mxu0 %v688_v32 }
  0x62   :  { %717 = vmatpush3.bf16.msra.mxu1 %v716_v35  ;;  %v114_v28 = vrot.slane %v109_v25, %v113_v24  ;;  %v118_v29 = vrot.slane %v109_v25, %v117_v26  ;;  %v122_v30 = vrot.slane %v109_v25, %v121_v27 }
  0x63   :  { %718 = vmatprep.subr.bf16.mxu1 %v850_v0 }
  0x64   :  { %691 = vmatpush3.bf16.msra.mxu0 %v690_v40 }
  0x65   :  { %693 = vmatprep.subr.bf16.mxu0 %v692_v41 }
  0x66   :  { %720 = vmatpush3.bf16.msra.mxu1 %v719_v44 }
  0x67   :  { %721 = vmatprep.subr.bf16.mxu1 %v850_v0 }
  0x68   :  { %695 = vmatpush3.bf16.msra.mxu0 %v694_v1 }
  0x69   :  { %697 = vmatprep.subr.bf16.mxu0 %v696_v49 }
  0x6a   :  { %723 = vmatpush3.bf16.msra.mxu1 %v722_v52 }
  0x6b   :  { %724 = vmatprep.subr.bf16.mxu1 %v850_v0 }
  0x6c   :  { %699 = vmatpush3.bf16.msra.mxu0 %v698_v57 }
  0x6d   :  { %701 = vmatprep.subr.bf16.mxu0 %v700_v58 }
  0x6e   :  { %726 = vmatpush3.bf16.msra.mxu1 %v725_v61 }
  0x6f   :  { %727 = vmatprep.subr.bf16.mxu1 %v850_v0 }
  0x70   :  { %703 = vmatpush3.bf16.msra.mxu0 %v702_v2 }
  0x71   :  { %705 = vmatprep.subr.bf16.mxu0 %v704_v3 }
  0x72   :  { %729 = vmatpush3.bf16.msra.mxu1 %v728_v9 }
  0x73   :  { %730 = vmatprep.subr.bf16.mxu1 %v850_v0 }
  0x74   :  { %707 = vmatpush3.bf16.msra.mxu0 %v706_v7 }
  0x75   :  { %709 = vmatprep.subr.bf16.mxu0 %v708_v12 }
  0x76   :  { %732 = vmatpush3.bf16.msra.mxu1 %v731_v18 }
  0x77   :  { %733 = vmatprep.subr.bf16.mxu1 %v850_v0 }
  0x78   :  { %711 = vmatpush3.bf16.msra.mxu0 %v710_v16 }
  0x7a   :  { %735 = vmatpush3.bf16.msra.mxu1 %v734_v21 }
 0x12e   :  { %v192_v31 = vpop.f32.mrb[0].mxu0 }
 0x12f   :  { %v193_v32 = vadd.f32 %v192_v31, %v114_v28  ;;  %v194_v33 = vpop.f32.mrb[1].mxu0 }
 0x130   :  { %v195_v34 = vadd.f32 %v194_v33, %v118_v29  ;;  %v263_v35 = vpop.f32.mrb[0].mxu1 }
 0x131   :  { %v264_v0 = vadd.f32 %v263_v35, %v122_v30  ;;  %v588_v36 = vpop.f32.mrb[1].mxu1  ;;  %v267_v38 = vmax.f32 %v193_v32, 0.0 }
 0x132   :  { %v268_v37 = vmax.f32 %v195_v34, 0.0 }
 0x133   :  { %v269_v39 = vmax.f32 %v264_v0, 0.0 }
 0x134   :  { %389 = vmatprep.mubr.f32.mxu0 %v268_v37 }
 0x135   :  { %390 = vmatmul.mubr.f32.vlgmr.msra.gmra.mrb[2].mxu0 %v267_v38  ;;  %622 = vmatmul.mubr.f32.vlgmr.msra.gmra.mrb[2].mxu1 %v269_v39 }
 0x208   :  { %v534_v40 = vpop.f32.mrb[2].mxu0  ;;  %v461_v41 = vpop.f32.mrb[2].mxu1 }
 0x209   :  { %v535_v42 = vpop.f32.mrb[3].mxu0  ;;  %v623_v44 = vpop.f32.mrb[3].mxu1 }
 0x20a   :  { %v536_v45 = vadd.f32 %v535_v42, %v534_v40 }
 0x20c   :  { %v392_v46 = vadd.f32 %v536_v45, %v484_v43 }
 0x20e   :  { %v462_v47 = vadd.f32 %v461_v41, %v392_v46 }
 0x210   :  { %747 = vtanh.f32 %v462_v47 }
 0x21a   :  { %v748_v48 = vpop.eup %747 }
 0x21b   :  { %v466_v1 = vmul.f32 2.0, %v748_v48 }
 0x21d   :  { %467 = vst [vmem:[#allocation8] sm:$0xff] %v466_v1 }
 0x21e   :  { %826 = shalt.err (!%p823_p0)
}
 0x21f   :  { %s827_s12 = scalar_lea.hbm %s964_s5, 128 }
 0x220   :  { %p828_p1 = scmp.ne.s32.totalorder %s964_s5, %s827_s12  ;;  %p831_p2 = scmp.lt.u32.totalorder %s827_s12, %s964_s5 }
 0x222   :  { %p833_p3 = pnand %p831_p2, %p828_p1 }
 0x224   :  { %836 = shalt.err (!%p833_p3)
}
 0x225   :  { %477 = dma.vmem_to_hbm [thread:$0]  %s475_s9, 128, %s964_s5, [#allocation4]  }
 0x226   :  { %841 = dma.done.wait [#allocation4], 128  }
 0x227   :  { %842 = vsyncadd [#allocation4], 4294967168 }
 0x228   :  { %481 = vsyncpa [#allocation3], 1 }
 0x229   :  { %482 = vsyncpa [#allocation6], 1 }
 0x22a   :  { %483 = vsyncpa [#allocation4], 1 }

</bundles_post_ra>
